<compile_context>
chip_gen: v6e
topology: v6e:2x2x1
jax: 0.10.0
libtpu: 0.0.40
codegen_flags: <defaults>
</compile_context>

<pallas_src>
import functools
import math

import jax
import jax.numpy as jnp
from jax import lax
from jax.experimental import pallas as pl
from jax.experimental.pallas import tpu as pltpu


def _layernorm(y, gamma, beta, eps=1e-5):
    # PyTorch LayerNorm: biased variance, eps inside sqrt.  f32 math.
    mu = jnp.mean(y, axis=-1, keepdims=True)
    d = y - mu
    var = jnp.mean(d * d, axis=-1, keepdims=True)
    return d * lax.rsqrt(var + eps) * gamma + beta


def encoder_layer_kernel(
    x_ref,
    wqkv_ref, bqkv_ref, wo_ref, w1_ref, b1_ref, w2_ref, vecd_ref,
    o_ref,
    *, num_heads, head_dim, block_b, seq_len, matmul_dtype,
):
    H, hd, bt, T = num_heads, head_dim, block_b, seq_len
    D = H * hd
    inv_scale = jnp.float32(1.0 / math.sqrt(hd))
    exact_recip = (matmul_dtype == jnp.float32)

    # Packed grid-invariant vectors: [bo, b2, g1, be1, g2, be2], each (1, D).
    bo = vecd_ref[0:1, :]
    b2 = vecd_ref[1:2, :]
    g1 = vecd_ref[2:3, :]
    be1 = vecd_ref[3:4, :]
    g2 = vecd_ref[4:5, :]
    be2 = vecd_ref[5:6, :]

    x = x_ref[...].reshape(bt * T, D)            # f32 activations (residual path)
    xm = x.astype(matmul_dtype)

    # Fused QKV projection: one MXU matmul with N = 3*D, f32 accumulation.
    qkv = (jnp.dot(xm, wqkv_ref[...], preferred_element_type=jnp.float32)
           + bqkv_ref[...])
    qkv_m = qkv.astype(matmul_dtype)             # single cast pass over qkv

    q = qkv_m[:, 0 * D:1 * D].reshape(bt, T, D)
    k = qkv_m[:, 1 * D:2 * D].reshape(bt, T, D)
    v = qkv_m[:, 2 * D:3 * D].reshape(bt, T, D)

    # Attention: one bt-batched dot_general per head (single batch dim -> clean
    # Mosaic lowering, only one (bt, T, T) score tile live at a time).
    head_outs = []
    for h in range(H):
        cols = slice(h * hd, (h + 1) * hd)
        qh, kh, vh = q[:, :, cols], k[:, :, cols], v[:, :, cols]

        s = jnp.einsum('bqd,bkd->bqk', qh, kh,
                       preferred_element_type=jnp.float32) * inv_scale
        s = s - jnp.max(s, axis=-1, keepdims=True)
        p = jnp.exp(s)                                            # f32 softmax
        denom = jnp.sum(p, axis=-1, keepdims=True)
        p = p * pl.reciprocal(denom, approx=not exact_recip)
        head_outs.append(
            jnp.einsum('bqk,bkd->bqd', p.astype(matmul_dtype), vh,
                       preferred_element_type=jnp.float32))

    # Lane-dense (bt*T, D) attention output assembled in vregs (no VMEM scratch).
    attn = jnp.concatenate(head_outs, axis=-1).reshape(bt * T, D)

    attn_out = (jnp.dot(attn.astype(matmul_dtype), wo_ref[...],
                        preferred_element_type=jnp.float32) + bo)

    # Residual + LayerNorm 1 (f32).
    y = _layernorm(x + attn_out, g1, be1)

    # Feed-forward: relu(y @ W1 + b1) @ W2 + b2.
    h1 = (jnp.dot(y.astype(matmul_dtype), w1_ref[...],
                  preferred_element_type=jnp.float32) + b1_ref[...])
    h1 = jnp.maximum(h1, 0.0)
    ff = (jnp.dot(h1.astype(matmul_dtype), w2_ref[...],
                  preferred_element_type=jnp.float32) + b2)

    # Residual + LayerNorm 2 (f32).
    z = _layernorm(y + ff, g2, be2)
    o_ref[...] = z.reshape(bt, T, D).astype(o_ref.dtype)


def _vmem_capacity_bytes():
    try:
        cap = getattr(pltpu.get_tpu_info(), "vmem_capacity_bytes", None)
        if cap:
            return int(cap)
    except Exception:
        pass
    return 64 * 1024 * 1024          # conservative: v7x per-TensorCore VMEM


def _vmem_estimate(block_b, T, D, FF, itemsize):
    rows = block_b * T
    # Grid-invariant weights (assume 2 pipeline buffers) + small vectors.
    weights = itemsize * (3 * D * D + D * D + 2 * D * FF) + 4 * (3 * D + FF + 6 * D)
    # Double-buffered f32 input/output activation blocks.
    io = 2 * 2 * 4 * rows * D
    # Kernel intermediates: qkv/h1 (f32 + matmul-dtype copy), one live score
    # tile, plus x/attn/y/ff/z working set with slack.
    act = rows * ((4 + itemsize) * (3 * D + FF) + 4 * 2 * T + 4 * 8 * D)
    return 2 * weights + io + act


def _pick_block_b(B, T, D, FF, itemsize, budget):
    divisors = sorted(d for d in range(1, B + 1) if B % d == 0)
    fitting = [d for d in divisors if _vmem_estimate(d, T, D, FF, itemsize) <= budget]
    if not fitting:
        return 1
    # Smallest block that fills the MXU M target (block_b*T >= 256), preferring
    # >= 2 grid steps so v7x can shard the parallel axis across its 2 TCs.
    for d in fitting:
        if d * T >= 256 and B // d >= 2:
            return d
    for d in fitting:
        if d * T >= 256:
            return d
    two_step = [d for d in fitting if B // d >= 2]
    return max(two_step) if two_step else max(fitting)


def transformer_encoder_layer(x, params, num_heads, *, block_b=None,
                              matmul_dtype=jnp.bfloat16):
    B, T, D = x.shape
    FF = params["w1"].shape[1]
    head_dim = D // num_heads
    itemsize = jnp.dtype(matmul_dtype).itemsize

    vmem_cap = _vmem_capacity_bytes()
    budget = int(0.7 * vmem_cap)
    if block_b is None:
        block_b = _pick_block_b(B, T, D, FF, itemsize, budget)
    assert B % block_b == 0

    est = _vmem_estimate(block_b, T, D, FF, itemsize)
    vmem_limit = int(min(0.9 * vmem_cap, max(2 * est, 32 * 1024 * 1024)))

    # Host-side (one-time) weight fusion / casts.
    wqkv = jnp.concatenate(
        [params["wq"], params["wk"], params["wv"]], axis=1).astype(matmul_dtype)
    bqkv = jnp.concatenate([params["bq"], params["bk"], params["bv"]], axis=1)
    wo = params["wo"].astype(matmul_dtype)
    w1 = params["w1"].astype(matmul_dtype)
    w2 = params["w2"].astype(matmul_dtype)
    # Pack the 6 D-length vectors into one (6, D) input.
    vecd = jnp.concatenate(
        [params["bo"], params["b2"], params["g1"], params["be1"],
         params["g2"], params["be2"]], axis=0).astype(jnp.float32)

    kernel = functools.partial(
        encoder_layer_kernel, num_heads=num_heads, head_dim=head_dim,
        block_b=block_b, seq_len=T, matmul_dtype=matmul_dtype)

    def rep2d(shape):
        return pl.BlockSpec(shape, lambda b: (0, 0))

    in_specs = [
        pl.BlockSpec((block_b, T, D), lambda b: (b, 0, 0)),  # x
        rep2d((D, 3 * D)), rep2d((1, 3 * D)),                # Wqkv, bqkv
        rep2d((D, D)),                                       # Wo
        rep2d((D, FF)), rep2d((1, FF)),                      # W1, b1
        rep2d((FF, D)),                                      # W2
        rep2d((6, D)),                                       # packed vectors
    ]

    flops = 2 * B * T * (4 * D * D + 2 * T * D + 2 * D * FF)
    transcendentals = B * num_heads * T * T
    bytes_accessed = (4 * 2 * B * T * D
                      + itemsize * (4 * D * D + 2 * D * FF)
                      + 4 * (3 * D + FF + 6 * D))

    return pl.pallas_call(
        kernel,
        out_shape=jax.ShapeDtypeStruct((B, T, D), x.dtype),
        grid_spec=pltpu.PrefetchScalarGridSpec(
            num_scalar_prefetch=0,
            grid=(B // block_b,),
            in_specs=in_specs,
            out_specs=pl.BlockSpec((block_b, T, D), lambda b: (b, 0, 0)),
        ),
        compiler_params=pltpu.CompilerParams(
            dimension_semantics=("parallel",),
            vmem_limit_bytes=vmem_limit),
        cost_estimate=pl.CostEstimate(
            flops=flops, transcendentals=transcendentals,
            bytes_accessed=bytes_accessed),
    )(x, wqkv, bqkv, wo, w1, params["b1"], w2, vecd)


def reference_forward(x, params, num_heads):
    """Pure-JAX reference matching the PyTorch forward (eval mode)."""
    B, T, D = x.shape
    hd = D // num_heads

    def linear(a, w, b):
        return a @ w + b[0]

    q = linear(x, params["wq"], params["bq"]).reshape(B, T, num_heads, hd).transpose(0, 2, 1, 3)
    k = linear(x, params["wk"], params["bk"]).reshape(B, T, num_heads, hd).transpose(0, 2, 1, 3)
    v = linear(x, params["wv"], params["bv"]).reshape(B, T, num_heads, hd).transpose(0, 2, 1, 3)
    s = jnp.einsum("bhqd,bhkd->bhqk", q, k) / math.sqrt(hd)
    p = jax.nn.softmax(s, axis=-1)
    a = jnp.einsum("bhqk,bhkd->bhqd", p, v).transpose(0, 2, 1, 3).reshape(B, T, D)
    attn_out = linear(a, params["wo"], params["bo"])

    def ln(y, g, b):
        mu = jnp.mean(y, -1, keepdims=True)
        var = jnp.mean((y - mu) ** 2, -1, keepdims=True)
        return (y - mu) / jnp.sqrt(var + 1e-5) * g[0] + b[0]

    y = ln(x + attn_out, params["g1"], params["be1"])
    ff = linear(jnp.maximum(linear(y, params["w1"], params["b1"]), 0.0),
                params["w2"], params["b2"])
    return ln(y + ff, params["g2"], params["be2"])


if __name__ == "__main__":
    # Small shapes: batch=4, seq=8, d_model=32, heads=4, dim_feedforward=128
    B, T, D, H = 4, 8, 32, 4
    FF = 4 * D

    key = jax.random.PRNGKey(0)
    keys = jax.random.split(key, 16)

    def w(k, shape, scale=0.05):
        return (scale * jax.random.normal(k, shape)).astype(jnp.float32)

    params = {
        "wq": w(keys[0], (D, D)),  "bq": w(keys[1], (1, D)),
        "wk": w(keys[2], (D, D)),  "bk": w(keys[3], (1, D)),
        "wv": w(keys[4], (D, D)),  "bv": w(keys[5], (1, D)),
        "wo": w(keys[6], (D, D)),  "bo": w(keys[7], (1, D)),
        "w1": w(keys[8], (D, FF)), "b1": w(keys[9], (1, FF)),
        "w2": w(keys[10], (FF, D)), "b2": w(keys[11], (1, D)),
        "g1": jnp.ones((1, D), jnp.float32), "be1": jnp.zeros((1, D), jnp.float32),
        "g2": jnp.ones((1, D), jnp.float32), "be2": jnp.zeros((1, D), jnp.float32),
    }

    x = jax.random.normal(keys[12], (B, T, D), dtype=jnp.float32)
    ref = reference_forward(x, params, num_heads=H)

    # f32 matmul path (exact softmax reciprocal), explicit block_b=2 -> 2
    # "parallel" grid steps.
    out = transformer_encoder_layer(x, params, num_heads=H, block_b=2,
                                    matmul_dtype=jnp.float32)
    out = jax.block_until_ready(out)
    assert out.shape == (B, T, D)
    assert jnp.allclose(out, ref, atol=2e-3, rtol=2e-3), (
        float(jnp.max(jnp.abs(out - ref))))

    # Default bf16 matmul-input path (f32 accumulation + f32 softmax/LayerNorm
    # math), auto-chosen batch block.
    out_bf16 = transformer_encoder_layer(x, params, num_heads=H)
    out_bf16 = jax.block_until_ready(out_bf16)
    assert jnp.allclose(out_bf16, ref, atol=5e-2, rtol=5e-2), (
        float(jnp.max(jnp.abs(out_bf16 - ref))))

    print("KERNEL_OK")
</pallas_src>

<mosaic_0001>
module attributes {stable_mosaic.version = 11 : i64} {
  func.func @encoder_layer_kernel(%arg0: i32, %arg1: memref<2x8x32xf32, #tpu.memory_space<vmem>>, %arg2: memref<32x96xf32, #tpu.memory_space<vmem>>, %arg3: memref<1x96xf32, #tpu.memory_space<vmem>>, %arg4: memref<32x32xf32, #tpu.memory_space<vmem>>, %arg5: memref<32x128xf32, #tpu.memory_space<vmem>>, %arg6: memref<1x128xf32, #tpu.memory_space<vmem>>, %arg7: memref<128x32xf32, #tpu.memory_space<vmem>>, %arg8: memref<6x32xf32, #tpu.memory_space<vmem>>, %arg9: memref<2x8x32xf32, #tpu.memory_space<vmem>>) attributes {dimension_semantics = [#tpu.dimension_semantics<parallel>], iteration_bounds = array<i64: 2>, scalar_prefetch = 0 : i64, scratch_operands = 0 : i64, tpu.core_type = #tpu.core_type<tc>, window_params = [{transform_indices = @transform_0, window_bounds = array<i64: 2, 8, 32>}, {pipeline_mode = #tpu.pipeline_mode<synchronous>, transform_indices = @transform_1, window_bounds = array<i64: 32, 96>}, {pipeline_mode = #tpu.pipeline_mode<synchronous>, transform_indices = @transform_2, window_bounds = array<i64: 1, 96>}, {pipeline_mode = #tpu.pipeline_mode<synchronous>, transform_indices = @transform_3, window_bounds = array<i64: 32, 32>}, {pipeline_mode = #tpu.pipeline_mode<synchronous>, transform_indices = @transform_4, window_bounds = array<i64: 32, 128>}, {pipeline_mode = #tpu.pipeline_mode<synchronous>, transform_indices = @transform_5, window_bounds = array<i64: 1, 128>}, {pipeline_mode = #tpu.pipeline_mode<synchronous>, transform_indices = @transform_6, window_bounds = array<i64: 128, 32>}, {pipeline_mode = #tpu.pipeline_mode<synchronous>, transform_indices = @transform_7, window_bounds = array<i64: 6, 32>}, {transform_indices = @transform_8, window_bounds = array<i64: 2, 8, 32>}]} {
    %c0 = arith.constant 0 : index
    %c0_0 = arith.constant 0 : index
    %0 = vector.load %arg8[%c0, %c0_0] : memref<6x32xf32, #tpu.memory_space<vmem>>, vector<1x32xf32>
    %c1 = arith.constant 1 : index
    %c0_1 = arith.constant 0 : index
    %1 = vector.load %arg8[%c1, %c0_1] : memref<6x32xf32, #tpu.memory_space<vmem>>, vector<1x32xf32>
    %c2 = arith.constant 2 : index
    %c0_2 = arith.constant 0 : index
    %2 = vector.load %arg8[%c2, %c0_2] : memref<6x32xf32, #tpu.memory_space<vmem>>, vector<1x32xf32>
    %c3 = arith.constant 3 : index
    %c0_3 = arith.constant 0 : index
    %3 = vector.load %arg8[%c3, %c0_3] : memref<6x32xf32, #tpu.memory_space<vmem>>, vector<1x32xf32>
    %c4 = arith.constant 4 : index
    %c0_4 = arith.constant 0 : index
    %4 = vector.load %arg8[%c4, %c0_4] : memref<6x32xf32, #tpu.memory_space<vmem>>, vector<1x32xf32>
    %c5 = arith.constant 5 : index
    %c0_5 = arith.constant 0 : index
    %5 = vector.load %arg8[%c5, %c0_5] : memref<6x32xf32, #tpu.memory_space<vmem>>, vector<1x32xf32>
    %c0_6 = arith.constant 0 : index
    %c0_7 = arith.constant 0 : index
    %c0_8 = arith.constant 0 : index
    %6 = vector.load %arg1[%c0_6, %c0_7, %c0_8] : memref<2x8x32xf32, #tpu.memory_space<vmem>>, vector<2x8x32xf32>
    %7 = vector.shape_cast %6 : vector<2x8x32xf32> to vector<16x32xf32>
    %c0_9 = arith.constant 0 : index
    %c0_10 = arith.constant 0 : index
    %8 = vector.load %arg2[%c0_9, %c0_10] : memref<32x96xf32, #tpu.memory_space<vmem>>, vector<32x96xf32>
    %cst = arith.constant dense<0.000000e+00> : vector<16x96xf32>
    %9 = tpu.matmul %7, %8, %cst {dimension_numbers = #tpu.dot_dimension_numbers<[1], [0], [0], [1], [0, 0, 1, 1], [], []>} : vector<16x32xf32>, vector<32x96xf32>, vector<16x96xf32> -> vector<16x96xf32>
    %c0_11 = arith.constant 0 : index
    %c0_12 = arith.constant 0 : index
    %10 = vector.load %arg3[%c0_11, %c0_12] : memref<1x96xf32, #tpu.memory_space<vmem>>, vector<1x96xf32>
    %11 = vector.broadcast %10 : vector<1x96xf32> to vector<16x96xf32>
    %12 = arith.addf %9, %11 : vector<16x96xf32>
    %13 = vector.extract_strided_slice %12 {offsets = [0, 0], sizes = [16, 32], strides = [1, 1]} : vector<16x96xf32> to vector<16x32xf32>
    %14 = vector.shape_cast %13 : vector<16x32xf32> to vector<2x8x32xf32>
    %15 = vector.extract_strided_slice %12 {offsets = [0, 32], sizes = [16, 32], strides = [1, 1]} : vector<16x96xf32> to vector<16x32xf32>
    %16 = vector.shape_cast %15 : vector<16x32xf32> to vector<2x8x32xf32>
    %17 = vector.extract_strided_slice %12 {offsets = [0, 64], sizes = [16, 32], strides = [1, 1]} : vector<16x96xf32> to vector<16x32xf32>
    %18 = vector.shape_cast %17 : vector<16x32xf32> to vector<2x8x32xf32>
    %19 = vector.extract_strided_slice %14 {offsets = [0, 0, 0], sizes = [2, 8, 8], strides = [1, 1, 1]} : vector<2x8x32xf32> to vector<2x8x8xf32>
    %20 = vector.extract_strided_slice %16 {offsets = [0, 0, 0], sizes = [2, 8, 8], strides = [1, 1, 1]} : vector<2x8x32xf32> to vector<2x8x8xf32>
    %21 = vector.extract_strided_slice %18 {offsets = [0, 0, 0], sizes = [2, 8, 8], strides = [1, 1, 1]} : vector<2x8x32xf32> to vector<2x8x8xf32>
    "tpu.trace_start"() <{level = 10 : i32, message = "bqd,bkd->bqk"}> : () -> ()
    %cst_13 = arith.constant dense<0.000000e+00> : vector<2x8x8xf32>
    %22 = tpu.matmul %19, %20, %cst_13 {dimension_numbers = #tpu.dot_dimension_numbers<[2], [2], [1], [1], [0, 0, 0, 1, 1, 1], [0], [0]>} : vector<2x8x8xf32>, vector<2x8x8xf32>, vector<2x8x8xf32> -> vector<2x8x8xf32>
    "tpu.trace_stop"() : () -> ()
    %cst_14 = arith.constant 0.353553385 : f32
    %23 = vector.broadcast %cst_14 : f32 to vector<2x8x8xf32>
    %24 = arith.mulf %22, %23 : vector<2x8x8xf32>
    %cst_15 = arith.constant dense<0xFF800000> : vector<2x8xf32>
    %25 = vector.multi_reduction <maximumf>, %24, %cst_15 [2] : vector<2x8x8xf32> to vector<2x8xf32>
    %26 = vector.shape_cast %25 : vector<2x8xf32> to vector<2x8x1xf32>
    %27 = vector.broadcast %26 : vector<2x8x1xf32> to vector<2x8x8xf32>
    %28 = arith.subf %24, %27 : vector<2x8x8xf32>
    %29 = math.exp %28 : vector<2x8x8xf32>
    %cst_16 = arith.constant dense<0.000000e+00> : vector<2x8xf32>
    %30 = vector.multi_reduction <add>, %29, %cst_16 [2] : vector<2x8x8xf32> to vector<2x8xf32>
    %31 = vector.shape_cast %30 : vector<2x8xf32> to vector<2x8x1xf32>
    %32 = tpu.reciprocal %31 : vector<2x8x1xf32> -> vector<2x8x1xf32>
    %33 = vector.broadcast %32 : vector<2x8x1xf32> to vector<2x8x8xf32>
    %34 = arith.mulf %29, %33 : vector<2x8x8xf32>
    "tpu.trace_start"() <{level = 10 : i32, message = "bqk,bkd->bqd"}> : () -> ()
    %cst_17 = arith.constant dense<0.000000e+00> : vector<2x8x8xf32>
    %35 = tpu.matmul %34, %21, %cst_17 {dimension_numbers = #tpu.dot_dimension_numbers<[2], [1], [1], [2], [0, 0, 0, 1, 1, 2], [0], [0]>} : vector<2x8x8xf32>, vector<2x8x8xf32>, vector<2x8x8xf32> -> vector<2x8x8xf32>
    "tpu.trace_stop"() : () -> ()
    %36 = vector.extract_strided_slice %14 {offsets = [0, 0, 8], sizes = [2, 8, 8], strides = [1, 1, 1]} : vector<2x8x32xf32> to vector<2x8x8xf32>
    %37 = vector.extract_strided_slice %16 {offsets = [0, 0, 8], sizes = [2, 8, 8], strides = [1, 1, 1]} : vector<2x8x32xf32> to vector<2x8x8xf32>
    %38 = vector.extract_strided_slice %18 {offsets = [0, 0, 8], sizes = [2, 8, 8], strides = [1, 1, 1]} : vector<2x8x32xf32> to vector<2x8x8xf32>
    "tpu.trace_start"() <{level = 10 : i32, message = "bqd,bkd->bqk"}> : () -> ()
    %cst_18 = arith.constant dense<0.000000e+00> : vector<2x8x8xf32>
    %39 = tpu.matmul %36, %37, %cst_18 {dimension_numbers = #tpu.dot_dimension_numbers<[2], [2], [1], [1], [0, 0, 0, 1, 1, 1], [0], [0]>} : vector<2x8x8xf32>, vector<2x8x8xf32>, vector<2x8x8xf32> -> vector<2x8x8xf32>
    "tpu.trace_stop"() : () -> ()
    %cst_19 = arith.constant 0.353553385 : f32
    %40 = vector.broadcast %cst_19 : f32 to vector<2x8x8xf32>
    %41 = arith.mulf %39, %40 : vector<2x8x8xf32>
    %cst_20 = arith.constant dense<0xFF800000> : vector<2x8xf32>
    %42 = vector.multi_reduction <maximumf>, %41, %cst_20 [2] : vector<2x8x8xf32> to vector<2x8xf32>
    %43 = vector.shape_cast %42 : vector<2x8xf32> to vector<2x8x1xf32>
    %44 = vector.broadcast %43 : vector<2x8x1xf32> to vector<2x8x8xf32>
    %45 = arith.subf %41, %44 : vector<2x8x8xf32>
    %46 = math.exp %45 : vector<2x8x8xf32>
    %cst_21 = arith.constant dense<0.000000e+00> : vector<2x8xf32>
    %47 = vector.multi_reduction <add>, %46, %cst_21 [2] : vector<2x8x8xf32> to vector<2x8xf32>
    %48 = vector.shape_cast %47 : vector<2x8xf32> to vector<2x8x1xf32>
    %49 = tpu.reciprocal %48 : vector<2x8x1xf32> -> vector<2x8x1xf32>
    %50 = vector.broadcast %49 : vector<2x8x1xf32> to vector<2x8x8xf32>
    %51 = arith.mulf %46, %50 : vector<2x8x8xf32>
    "tpu.trace_start"() <{level = 10 : i32, message = "bqk,bkd->bqd"}> : () -> ()
    %cst_22 = arith.constant dense<0.000000e+00> : vector<2x8x8xf32>
    %52 = tpu.matmul %51, %38, %cst_22 {dimension_numbers = #tpu.dot_dimension_numbers<[2], [1], [1], [2], [0, 0, 0, 1, 1, 2], [0], [0]>} : vector<2x8x8xf32>, vector<2x8x8xf32>, vector<2x8x8xf32> -> vector<2x8x8xf32>
    "tpu.trace_stop"() : () -> ()
    %53 = vector.extract_strided_slice %14 {offsets = [0, 0, 16], sizes = [2, 8, 8], strides = [1, 1, 1]} : vector<2x8x32xf32> to vector<2x8x8xf32>
    %54 = vector.extract_strided_slice %16 {offsets = [0, 0, 16], sizes = [2, 8, 8], strides = [1, 1, 1]} : vector<2x8x32xf32> to vector<2x8x8xf32>
    %55 = vector.extract_strided_slice %18 {offsets = [0, 0, 16], sizes = [2, 8, 8], strides = [1, 1, 1]} : vector<2x8x32xf32> to vector<2x8x8xf32>
    "tpu.trace_start"() <{level = 10 : i32, message = "bqd,bkd->bqk"}> : () -> ()
    %cst_23 = arith.constant dense<0.000000e+00> : vector<2x8x8xf32>
    %56 = tpu.matmul %53, %54, %cst_23 {dimension_numbers = #tpu.dot_dimension_numbers<[2], [2], [1], [1], [0, 0, 0, 1, 1, 1], [0], [0]>} : vector<2x8x8xf32>, vector<2x8x8xf32>, vector<2x8x8xf32> -> vector<2x8x8xf32>
    "tpu.trace_stop"() : () -> ()
    %cst_24 = arith.constant 0.353553385 : f32
    %57 = vector.broadcast %cst_24 : f32 to vector<2x8x8xf32>
    %58 = arith.mulf %56, %57 : vector<2x8x8xf32>
    %cst_25 = arith.constant dense<0xFF800000> : vector<2x8xf32>
    %59 = vector.multi_reduction <maximumf>, %58, %cst_25 [2] : vector<2x8x8xf32> to vector<2x8xf32>
    %60 = vector.shape_cast %59 : vector<2x8xf32> to vector<2x8x1xf32>
    %61 = vector.broadcast %60 : vector<2x8x1xf32> to vector<2x8x8xf32>
    %62 = arith.subf %58, %61 : vector<2x8x8xf32>
    %63 = math.exp %62 : vector<2x8x8xf32>
    %cst_26 = arith.constant dense<0.000000e+00> : vector<2x8xf32>
    %64 = vector.multi_reduction <add>, %63, %cst_26 [2] : vector<2x8x8xf32> to vector<2x8xf32>
    %65 = vector.shape_cast %64 : vector<2x8xf32> to vector<2x8x1xf32>
    %66 = tpu.reciprocal %65 : vector<2x8x1xf32> -> vector<2x8x1xf32>
    %67 = vector.broadcast %66 : vector<2x8x1xf32> to vector<2x8x8xf32>
    %68 = arith.mulf %63, %67 : vector<2x8x8xf32>
    "tpu.trace_start"() <{level = 10 : i32, message = "bqk,bkd->bqd"}> : () -> ()
    %cst_27 = arith.constant dense<0.000000e+00> : vector<2x8x8xf32>
    %69 = tpu.matmul %68, %55, %cst_27 {dimension_numbers = #tpu.dot_dimension_numbers<[2], [1], [1], [2], [0, 0, 0, 1, 1, 2], [0], [0]>} : vector<2x8x8xf32>, vector<2x8x8xf32>, vector<2x8x8xf32> -> vector<2x8x8xf32>
    "tpu.trace_stop"() : () -> ()
    %70 = vector.extract_strided_slice %14 {offsets = [0, 0, 24], sizes = [2, 8, 8], strides = [1, 1, 1]} : vector<2x8x32xf32> to vector<2x8x8xf32>
    %71 = vector.extract_strided_slice %16 {offsets = [0, 0, 24], sizes = [2, 8, 8], strides = [1, 1, 1]} : vector<2x8x32xf32> to vector<2x8x8xf32>
    %72 = vector.extract_strided_slice %18 {offsets = [0, 0, 24], sizes = [2, 8, 8], strides = [1, 1, 1]} : vector<2x8x32xf32> to vector<2x8x8xf32>
    "tpu.trace_start"() <{level = 10 : i32, message = "bqd,bkd->bqk"}> : () -> ()
    %cst_28 = arith.constant dense<0.000000e+00> : vector<2x8x8xf32>
    %73 = tpu.matmul %70, %71, %cst_28 {dimension_numbers = #tpu.dot_dimension_numbers<[2], [2], [1], [1], [0, 0, 0, 1, 1, 1], [0], [0]>} : vector<2x8x8xf32>, vector<2x8x8xf32>, vector<2x8x8xf32> -> vector<2x8x8xf32>
    "tpu.trace_stop"() : () -> ()
    %cst_29 = arith.constant 0.353553385 : f32
    %74 = vector.broadcast %cst_29 : f32 to vector<2x8x8xf32>
    %75 = arith.mulf %73, %74 : vector<2x8x8xf32>
    %cst_30 = arith.constant dense<0xFF800000> : vector<2x8xf32>
    %76 = vector.multi_reduction <maximumf>, %75, %cst_30 [2] : vector<2x8x8xf32> to vector<2x8xf32>
    %77 = vector.shape_cast %76 : vector<2x8xf32> to vector<2x8x1xf32>
    %78 = vector.broadcast %77 : vector<2x8x1xf32> to vector<2x8x8xf32>
    %79 = arith.subf %75, %78 : vector<2x8x8xf32>
    %80 = math.exp %79 : vector<2x8x8xf32>
    %cst_31 = arith.constant dense<0.000000e+00> : vector<2x8xf32>
    %81 = vector.multi_reduction <add>, %80, %cst_31 [2] : vector<2x8x8xf32> to vector<2x8xf32>
    %82 = vector.shape_cast %81 : vector<2x8xf32> to vector<2x8x1xf32>
    %83 = tpu.reciprocal %82 : vector<2x8x1xf32> -> vector<2x8x1xf32>
    %84 = vector.broadcast %83 : vector<2x8x1xf32> to vector<2x8x8xf32>
    %85 = arith.mulf %80, %84 : vector<2x8x8xf32>
    "tpu.trace_start"() <{level = 10 : i32, message = "bqk,bkd->bqd"}> : () -> ()
    %cst_32 = arith.constant dense<0.000000e+00> : vector<2x8x8xf32>
    %86 = tpu.matmul %85, %72, %cst_32 {dimension_numbers = #tpu.dot_dimension_numbers<[2], [1], [1], [2], [0, 0, 0, 1, 1, 2], [0], [0]>} : vector<2x8x8xf32>, vector<2x8x8xf32>, vector<2x8x8xf32> -> vector<2x8x8xf32>
    "tpu.trace_stop"() : () -> ()
    %87 = tpu.concatenate %35, %52, %69, %86 in 2 : vector<2x8x8xf32>, vector<2x8x8xf32>, vector<2x8x8xf32>, vector<2x8x8xf32> -> vector<2x8x32xf32>
    %88 = vector.shape_cast %87 : vector<2x8x32xf32> to vector<16x32xf32>
    %c0_33 = arith.constant 0 : index
    %c0_34 = arith.constant 0 : index
    %89 = vector.load %arg4[%c0_33, %c0_34] : memref<32x32xf32, #tpu.memory_space<vmem>>, vector<32x32xf32>
    %cst_35 = arith.constant dense<0.000000e+00> : vector<16x32xf32>
    %90 = tpu.matmul %88, %89, %cst_35 {dimension_numbers = #tpu.dot_dimension_numbers<[1], [0], [0], [1], [0, 0, 1, 1], [], []>} : vector<16x32xf32>, vector<32x32xf32>, vector<16x32xf32> -> vector<16x32xf32>
    %91 = vector.broadcast %0 : vector<1x32xf32> to vector<16x32xf32>
    %92 = arith.addf %90, %91 : vector<16x32xf32>
    %93 = arith.addf %7, %92 : vector<16x32xf32>
    %cst_36 = arith.constant dense<0.000000e+00> : vector<16xf32>
    %94 = vector.multi_reduction <add>, %93, %cst_36 [1] : vector<16x32xf32> to vector<16xf32>
    %95 = vector.shape_cast %94 : vector<16xf32> to vector<16x1xf32>
    %cst_37 = arith.constant 3.200000e+01 : f32
    %96 = vector.broadcast %cst_37 : f32 to vector<16x1xf32>
    %97 = arith.divf %95, %96 : vector<16x1xf32>
    %98 = vector.broadcast %97 : vector<16x1xf32> to vector<16x32xf32>
    %99 = arith.subf %93, %98 : vector<16x32xf32>
    %100 = arith.mulf %99, %99 : vector<16x32xf32>
    %cst_38 = arith.constant dense<0.000000e+00> : vector<16xf32>
    %101 = vector.multi_reduction <add>, %100, %cst_38 [1] : vector<16x32xf32> to vector<16xf32>
    %102 = vector.shape_cast %101 : vector<16xf32> to vector<16x1xf32>
    %cst_39 = arith.constant 3.200000e+01 : f32
    %103 = vector.broadcast %cst_39 : f32 to vector<16x1xf32>
    %104 = arith.divf %102, %103 : vector<16x1xf32>
    %cst_40 = arith.constant 9.99999974E-6 : f32
    %105 = vector.broadcast %cst_40 : f32 to vector<16x1xf32>
    %106 = arith.addf %104, %105 : vector<16x1xf32>
    %107 = math.rsqrt %106 : vector<16x1xf32>
    %108 = vector.broadcast %107 : vector<16x1xf32> to vector<16x32xf32>
    %109 = arith.mulf %99, %108 : vector<16x32xf32>
    %110 = vector.broadcast %2 : vector<1x32xf32> to vector<16x32xf32>
    %111 = arith.mulf %109, %110 : vector<16x32xf32>
    %112 = vector.broadcast %3 : vector<1x32xf32> to vector<16x32xf32>
    %113 = arith.addf %111, %112 : vector<16x32xf32>
    %c0_41 = arith.constant 0 : index
    %c0_42 = arith.constant 0 : index
    %114 = vector.load %arg5[%c0_41, %c0_42] : memref<32x128xf32, #tpu.memory_space<vmem>>, vector<32x128xf32>
    %cst_43 = arith.constant dense<0.000000e+00> : vector<16x128xf32>
    %115 = tpu.matmul %113, %114, %cst_43 {dimension_numbers = #tpu.dot_dimension_numbers<[1], [0], [0], [1], [0, 0, 1, 1], [], []>} : vector<16x32xf32>, vector<32x128xf32>, vector<16x128xf32> -> vector<16x128xf32>
    %c0_44 = arith.constant 0 : index
    %c0_45 = arith.constant 0 : index
    %116 = vector.load %arg6[%c0_44, %c0_45] : memref<1x128xf32, #tpu.memory_space<vmem>>, vector<1x128xf32>
    %117 = vector.broadcast %116 : vector<1x128xf32> to vector<16x128xf32>
    %118 = arith.addf %115, %117 : vector<16x128xf32>
    %cst_46 = arith.constant 0.000000e+00 : f32
    %119 = vector.broadcast %cst_46 : f32 to vector<16x128xf32>
    %120 = arith.maximumf %118, %119 : vector<16x128xf32>
    %c0_47 = arith.constant 0 : index
    %c0_48 = arith.constant 0 : index
    %121 = vector.load %arg7[%c0_47, %c0_48] : memref<128x32xf32, #tpu.memory_space<vmem>>, vector<128x32xf32>
    %cst_49 = arith.constant dense<0.000000e+00> : vector<16x32xf32>
    %122 = tpu.matmul %120, %121, %cst_49 {dimension_numbers = #tpu.dot_dimension_numbers<[1], [0], [0], [1], [0, 0, 1, 1], [], []>} : vector<16x128xf32>, vector<128x32xf32>, vector<16x32xf32> -> vector<16x32xf32>
    %123 = vector.broadcast %1 : vector<1x32xf32> to vector<16x32xf32>
    %124 = arith.addf %122, %123 : vector<16x32xf32>
    %125 = arith.addf %113, %124 : vector<16x32xf32>
    %cst_50 = arith.constant dense<0.000000e+00> : vector<16xf32>
    %126 = vector.multi_reduction <add>, %125, %cst_50 [1] : vector<16x32xf32> to vector<16xf32>
    %127 = vector.shape_cast %126 : vector<16xf32> to vector<16x1xf32>
    %cst_51 = arith.constant 3.200000e+01 : f32
    %128 = vector.broadcast %cst_51 : f32 to vector<16x1xf32>
    %129 = arith.divf %127, %128 : vector<16x1xf32>
    %130 = vector.broadcast %129 : vector<16x1xf32> to vector<16x32xf32>
    %131 = arith.subf %125, %130 : vector<16x32xf32>
    %132 = arith.mulf %131, %131 : vector<16x32xf32>
    %cst_52 = arith.constant dense<0.000000e+00> : vector<16xf32>
    %133 = vector.multi_reduction <add>, %132, %cst_52 [1] : vector<16x32xf32> to vector<16xf32>
    %134 = vector.shape_cast %133 : vector<16xf32> to vector<16x1xf32>
    %cst_53 = arith.constant 3.200000e+01 : f32
    %135 = vector.broadcast %cst_53 : f32 to vector<16x1xf32>
    %136 = arith.divf %134, %135 : vector<16x1xf32>
    %cst_54 = arith.constant 9.99999974E-6 : f32
    %137 = vector.broadcast %cst_54 : f32 to vector<16x1xf32>
    %138 = arith.addf %136, %137 : vector<16x1xf32>
    %139 = math.rsqrt %138 : vector<16x1xf32>
    %140 = vector.broadcast %139 : vector<16x1xf32> to vector<16x32xf32>
    %141 = arith.mulf %131, %140 : vector<16x32xf32>
    %142 = vector.broadcast %4 : vector<1x32xf32> to vector<16x32xf32>
    %143 = arith.mulf %141, %142 : vector<16x32xf32>
    %144 = vector.broadcast %5 : vector<1x32xf32> to vector<16x32xf32>
    %145 = arith.addf %143, %144 : vector<16x32xf32>
    %146 = vector.shape_cast %145 : vector<16x32xf32> to vector<2x8x32xf32>
    %c0_55 = arith.constant 0 : index
    %c0_56 = arith.constant 0 : index
    %c0_57 = arith.constant 0 : index
    %147 = vector.load %arg9[%c0_55, %c0_56, %c0_57] : memref<2x8x32xf32, #tpu.memory_space<vmem>>, vector<2x8x32xf32>
    tpu.vector_store %arg9[%c0_55, %c0_56, %c0_57], %146 {strides = array<i32>} : memref<2x8x32xf32, #tpu.memory_space<vmem>>, vector<2x8x32xf32>,
    return
  }
  func.func @transform_0(%arg0: i32) -> (i32, i32, i32) {
    %c0_i32 = arith.constant 0 : i32
    %c0_i32_0 = arith.constant 0 : i32
    %c0_i32_1 = arith.constant 0 : i32
    return %arg0, %c0_i32, %c0_i32_0 : i32, i32, i32
  }
  func.func @transform_1(%arg0: i32) -> (i32, i32) {
    %c0_i32 = arith.constant 0 : i32
    %c0_i32_0 = arith.constant 0 : i32
    %c0_i32_1 = arith.constant 0 : i32
    return %c0_i32, %c0_i32_0 : i32, i32
  }
  func.func @transform_2(%arg0: i32) -> (i32, i32) {
    %c0_i32 = arith.constant 0 : i32
    %c0_i32_0 = arith.constant 0 : i32
    %c0_i32_1 = arith.constant 0 : i32
    return %c0_i32, %c0_i32_0 : i32, i32
  }
  func.func @transform_3(%arg0: i32) -> (i32, i32) {
    %c0_i32 = arith.constant 0 : i32
    %c0_i32_0 = arith.constant 0 : i32
    %c0_i32_1 = arith.constant 0 : i32
    return %c0_i32, %c0_i32_0 : i32, i32
  }
  func.func @transform_4(%arg0: i32) -> (i32, i32) {
    %c0_i32 = arith.constant 0 : i32
    %c0_i32_0 = arith.constant 0 : i32
    %c0_i32_1 = arith.constant 0 : i32
    return %c0_i32, %c0_i32_0 : i32, i32
  }
  func.func @transform_5(%arg0: i32) -> (i32, i32) {
    %c0_i32 = arith.constant 0 : i32
    %c0_i32_0 = arith.constant 0 : i32
    %c0_i32_1 = arith.constant 0 : i32
    return %c0_i32, %c0_i32_0 : i32, i32
  }
  func.func @transform_6(%arg0: i32) -> (i32, i32) {
    %c0_i32 = arith.constant 0 : i32
    %c0_i32_0 = arith.constant 0 : i32
    %c0_i32_1 = arith.constant 0 : i32
    return %c0_i32, %c0_i32_0 : i32, i32
  }
  func.func @transform_7(%arg0: i32) -> (i32, i32) {
    %c0_i32 = arith.constant 0 : i32
    %c0_i32_0 = arith.constant 0 : i32
    %c0_i32_1 = arith.constant 0 : i32
    return %c0_i32, %c0_i32_0 : i32, i32
  }
  func.func @transform_8(%arg0: i32) -> (i32, i32, i32) {
    %c0_i32 = arith.constant 0 : i32
    %c0_i32_0 = arith.constant 0 : i32
    %c0_i32_1 = arith.constant 0 : i32
    return %arg0, %c0_i32, %c0_i32_0 : i32, i32, i32
  }
}

</mosaic_0001>

<bundles_post_ra>
// kernel: tpu_custom_call.1
= control target key start
LH: loop header
LB: loop body
LE: loop exit
PB: predicated region body
PF: predicated region fallthrough
CT: control target
= control target key end

     0   :  { %13 = vsyncpa [#allocation3], 0  ;;  %s3068_s0 = inlined_call_operand.vmem [shape: f32[4,8,32], index: 0, kind: input, shape index: {}]   ;;  %s3069_s1 = inlined_call_operand.vmem [shape: f32[32,96], index: 1, kind: input, shape index: {}]   ;;  %s3070_s2 = inlined_call_operand.vmem [shape: f32[1,96], index: 2, kind: input, shape index: {}]   ;;  %s3071_s3 = inlined_call_operand.vmem [shape: f32[32,32], index: 3, kind: input, shape index: {}]   ;;  %s3072_s4 = inlined_call_operand.vmem [shape: f32[32,128], index: 4, kind: input, shape index: {}]   ;;  %s3073_s5 = inlined_call_operand.vmem [shape: f32[1,128], index: 5, kind: input, shape index: {}]   ;;  %s3074_s6 = inlined_call_operand.vmem [shape: f32[128,32], index: 6, kind: input, shape index: {}]   ;;  %s3075_s7 = inlined_call_operand.vmem [shape: f32[6,32], index: 7, kind: input, shape index: {}]   ;;  %s3076_s8 = inlined_call_operand.hbm [shape: f32[4,8,32], index: 8, kind: output, shape index: {}]  }
   0x1   :  { %15 = vsyncpa [#allocation3 + $0x1], 0  ;;  %s2692_s27 = smov 0   ;;  %s2694_s28 = smov 0  }
   0x2   :  { %s2696_s29 = smov 0   ;;  %s2698_s30 = smov 0  }
   0x3 LB: > { %s2713_s9 = sadd.s32 4294967295, %s2627_s30   ;;  %s2204_s10 = sadd.s32 4294967294, %s2627_s30   ;;  %s2627_s30 = sphi %s2698_s30, %s3082_s30   ;;  %s2623_s29 = sphi %s2696_s29, %s3081_s29   ;;  %s2619_s28 = sphi %s2694_s28, %s3080_s28   ;;  %s2615_s27 = sphi %s2692_s27, %s3079_s27  }
   0x4   : > { %s2717_s11 = sadd.s32 1, %s2627_s30   ;;  %s201_s12 = sadd.s32 1, %s2623_s29 }
   0x5   : > { %s198_s13 = ssub.s32 %s2627_s30, %s2717_s11  ;;  %p211_p0 = scmp.ne.s32.totalorder %s2623_s29, %s2619_s28 }
   0x6   : > { %p199_p1 = scmp.eq.s32.totalorder %s198_s13, 0  ;;  %p212_p2 = scmp.eq.s32.totalorder %s2713_s9, 1 }
   0x7   : > { %p217_p3 = scmp.ne.s32.totalorder %s2619_s28, %s2615_s27  ;;  %p218_p4 = scmp.eq.s32.totalorder %s2204_s10, 1 }
   0x8   : > { %s2728_s14 = scalar_select %p199_p1, %s2623_s29, %s201_s12  }
   0x9   : > { %p2730_p5 = por %p212_p2, %p211_p0  ;;  %p2734_p6 = por %p218_p4, %p217_p3 }
   0xa   : > { %p2207_p7 = scmp.ge.s32.totalorder %s2627_s30, 1  ;;  %p266_p8 = scmp.lt.s32.totalorder %s2627_s30, 3 }
   0xc   : > { %p267_p9 = pnand %p2207_p7, %p266_p8 }
   0xd   : > { %s2209_s21 = sshll.u32 (!%p267_p9), %s2713_s9, 1  ;;  %s2631_s19 = smov (!%p267_p9), 96  }
   0xe   : > { %270 = sbr.rel (%p267_p9) target bundleno = 3928 (0xf58), region = 52  ;;  %p301_p10 = scmp.lt.s32.totalorder (!%p267_p9), %s2209_s21, 3 }
   0xf   : > { %s2632_s20 = smov (!%p267_p9), 64   ;;  %s2634_s22 = smov (!%p267_p9), 120  }
  0x10   : > { %s2635_s23 = smov (!%p267_p9), 56   ;;  %s2636_s24 = smov (!%p267_p9), 80  }
  0x11   : > { %s2637_s25 = smov (!%p267_p9), 112   ;;  %s2639_s10 = smov (!%p267_p9), 72  }
  0x12   : > { %s2640_s12 = smov (!%p267_p9), 104   ;;  %s2642_s17 = smov (!%p267_p9), 8  }
  0x13   : > { %v318_v0 = vld [vmem:[%s3069_s1 + $0x18] sm:$0xff]  ;;  %v317_v1 = vld [vmem:[%s3069_s1 + $0x10] sm:$0xff]  ;;  %v316_v2 = vld [vmem:[%s3069_s1 + $0x8] sm:$0xff]  ;;  %s3084_s21 = smov (!%p301_p10, %s2209_s21), 3  ;;  %vm326_vm0 = vcmask 261120   ;;  %v2629_v6 = vmov 0.0  }
  0x14   : > { %2323 = vmatprep.subr.mxu1 %v318_v0  ;;  %v315_v3 = vld [vmem:[%s3069_s1] sm:$0xff]  ;;  %s2210_s26 = sshll.u32 %s3084_s21, 3  ;;  %2344 = vmatprep.subr.mxu0 %v2629_v6  ;;  %vm2630_vm1 = vmmov 0   ;;  %vm411_vm2 = vcmask 64512   ;;  %s2633_s21 = smov 88   ;;  %vm1764_vm3 = vcmask 195584  }
  0x15   : > { %2324 = vmatpush3.msra.mxu1 %v318_v0  ;;  %s304_s13 = scalar_lea.vmem %s3068_s0, %s2210_s26  ;;  %2346 = vmatprep.mubr.msk.f32.mxu0 %vm2630_vm1, %v2629_v6  ;;  %v2211_v8 = vld [vmem:[%s3070_s2] ss:$0 sm:$0xff]  ;;  %s2638_s26 = smov 48   ;;  %vm1761_vm4 = vcmask 130048  }
  0x16   : > { %2325 = vmatprep.subr.mxu1 %v317_v1  ;;  %v2756_v4 = vld [vmem:[%s304_s13] sm:$0xff]  ;;  %v2758_v5 = vld [vmem:[%s304_s13 + $0x8] sm:$0xff]  ;;  %s2641_s13 = smov 40   ;;  %s2643_s18 = smov 16  }
  0x17   : > { %2326 = vmatpush3.msra.mxu1 %v317_v1  ;;  %2331 = vmatprep.mubr.msk.f32.mxu1 %vm326_vm0, %v2756_v4 }
  0x18   : > { %2327 = vmatprep.subr.mxu1 %v316_v2 }
  0x19   : > { %2328 = vmatpush3.msra.mxu1 %v316_v2 }
  0x1a   : > { %2329 = vmatprep.subr.mxu1 %v315_v3 }
  0x1b   : > { %2330 = vmatpush3.msra.mxu1 %v315_v3 }
  0x1c   : > { %2332 = vmatmul.mubr.msk.f32.vlgmr.msra.gmra.mxu1 %vm326_vm0, %v2758_v5  ;;  %2334 = vmatprep.subr.mxu1 %v2629_v6 }
  0x1d   : > { %2336 = vmatprep.mubr.msk.f32.mxu1 %vm2630_vm1, %v2629_v6 }
  0xdc   : > { %v2333_v7 = vpop.f32.mrf.mxu1 }
  0xdd   : > { %v2776_v11 = vadd.f32 %v2333_v7, %v2211_v8 }
  0xde   : > { %v399_v9 = vpop.f32.mrf.mxu1 }
  0xdf   : > { %v2773_v10 = vadd.f32 %v2211_v8, %v399_v9 }
  0xe1   : > { %409 = vrot.lane.b32.xlu0 %v2773_v10, %s2631_s19 }
  0xe5   : > { %487 = vrot.lane.b32.xlu0 %v2776_v11, %s2631_s19 }
 0x153   : > { %v410_v12 = vpop.permute.xlu0 %409 }
 0x154   : > { %2335 = vmatpush3.xpose.msk.msra.mxu1 %vm411_vm2, %v410_v12 }
 0x155   : > { %2339 = vmatprep.subr.mxu1 %v2629_v6 }
 0x157   : > { %2337 = vmatmul.mubr.msk.f32.vlgmr.msra.gmra.mxu1 %vm411_vm2, %v2773_v10  ;;  %v488_v13 = vpop.permute.xlu0 %487 }
 0x158   : > { %2340 = vmatpush3.xpose.msk.msra.mxu1 %vm411_vm2, %v488_v13  ;;  %2341 = vmatprep.mubr.msk.f32.mxu1 %vm2630_vm1, %v2629_v6 }
 0x159   : > { %2349 = vmatprep.subr.mxu1 %v2629_v6 }
 0x15b   : > { %2342 = vmatmul.mubr.msk.f32.vlgmr.msra.gmra.mxu1 %vm411_vm2, %v2776_v11 }
 0x15c   : > { %2351 = vmatprep.mubr.msk.f32.mxu1 %vm2630_vm1, %v2629_v6 }
 0x217   : > { %v482_v14 = vpop.f32.mrf.mxu1 }
 0x218   : > { %v563_v15 = vmul.f32 0.35355338, %v482_v14 }
 0x219   : > { %v2338_v16 = vpop.f32.mrf.mxu1 }
 0x21a   : > { %v565_v17 = vsel %vm411_vm2, %v563_v15, -inf }
 0x21b   : > { %566 = vmax.xlane.f32.xlu1 %v565_v17  ;;  %v559_v18 = vpop.f32.mrf.mxu1 }
 0x21c   : > { %v564_v19 = vmul.f32 0.35355338, %v559_v18 }
 0x21d   : > { %v2343_v20 = vpop.f32.mrf.mxu1 }
 0x21e   : > { %v568_v21 = vsel %vm411_vm2, %v564_v19, -inf }
 0x21f   : > { %569 = vmax.xlane.f32.xlu1 %v568_v21 }
 0x230   : > { %587 = vrot.lane.b32.xlu1 %v2773_v10, %s2632_s20 }
 0x234   : > { %663 = vrot.lane.b32.xlu1 %v2776_v11, %s2632_s20  ;;  %s2645_s20 = smov [#allocation2]  }
 0x238   : > { %741 = vrot.lane.b32.xlu1 %v2773_v10, %s2633_s21 }
 0x23c   : > { %819 = vrot.lane.b32.xlu1 %v2776_v11, %s2633_s21  ;;  %s2571_s21 = sshll.u32 %s2645_s20, 4  ;;  %s2572_s21 = int_to_ptr.vmem [resolvable:$false] %s2571_s21 }
 0x2a4   : > { %v567_v22 = vpop.xlane.xlu1 %566 }
 0x2a5   : > { %v571_v23 = vsub.f32 %v563_v15, %v567_v22 }
 0x2a7   : > { %v573_v24 = vmul.f32 1.442695, %v571_v23 }
 0x2a8   : > { %v570_v25 = vpop.xlane.xlu1 %569 }
 0x2a9   : > { %2527 = vpow2.f32 %v573_v24  ;;  %v572_v26 = vsub.f32 %v564_v19, %v570_v25 }
 0x2ab   : > { %v575_v27 = vmul.f32 1.442695, %v572_v26 }
 0x2ac   : > { %v588_v28 = vpop.permute.xlu1 %587 }
 0x2ad   : > { %2529 = vpow2.f32 %v575_v27  ;;  %2345 = vmatpush3.msra.mxu0 %v588_v28 }
 0x2ae   : > { %2354 = vmatprep.subr.mxu0 %v2629_v6 }
 0x2b0   : > { %v664_v29 = vpop.permute.xlu1 %663 }
 0x2b1   : > { %2350 = vmatpush3.msra.mxu1 %v664_v29 }
 0x2b2   : > { %2359 = vmatprep.subr.mxu1 %v2629_v6 }
 0x2b4   : > { %v742_v34 = vpop.permute.xlu1 %741 }
 0x2b6   : > { %v2528_v30 = vpop.eup %2527 }
 0x2b7   : > { %v577_v31 = vsel %vm411_vm2, %v2528_v30, 0.0 }
 0x2b8   : > { %578 = vadd.xlane.f32.xlu0 %v577_v31  ;;  %v820_v35 = vpop.permute.xlu1 %819 }
 0x2ba   : > { %v2530_v32 = vpop.eup %2529 }
 0x2bb   : > { %v580_v33 = vsel %vm411_vm2, %v2530_v32, 0.0 }
 0x2bc   : > { %581 = vadd.xlane.f32.xlu1 %v580_v33 }
 0x2cd   : > { %817 = vrot.lane.b32.xlu1 %v2776_v11, %s2634_s22 }
 0x2ce   : > { %739 = vrot.lane.b32.xlu0 %v2773_v10, %s2634_s22  ;;  %s2573_s22 = scalar_lea.vmem %s2572_s21, 512 }
 0x341   : > { %v579_v36 = vpop.xlane.xlu0 %578 }
 0x342   : > { %2531 = vrcp.f32 %v579_v36 }
 0x345   : > { %v582_v37 = vpop.xlane.xlu1 %581  ;;  %v740_v42 = vpop.permute.xlu0 %739 }
 0x346   : > { %2533 = vrcp.f32 %v582_v37 }
 0x349   : > { %v818_v43 = vpop.permute.xlu1 %817 }
 0x34f   : > { %v2532_v38 = vpop.eup %2531 }
 0x350   : > { %v585_v39 = vmul.f32 %v2532_v38, %v2528_v30 }
 0x352   : > { %2347 = vmatmul.mubr.msk.f32.vlgmr.msra.gmra.mxu0 %vm411_vm2, %v585_v39 }
 0x353   : > { %v2534_v40 = vpop.eup %2533  ;;  %2355 = vmatpush3.xpose.msk.msra.mxu0 %vm411_vm2, %v742_v34  ;;  %2356 = vmatprep.mubr.msk.f32.mxu0 %vm2630_vm1, %v2629_v6 }
 0x354   : > { %v586_v41 = vmul.f32 %v2534_v40, %v2530_v32  ;;  %2364 = vmatprep.subr.mxu0 %v2629_v6 }
 0x356   : > { %2352 = vmatmul.mubr.msk.f32.vlgmr.msra.gmra.mxu1 %vm411_vm2, %v586_v41  ;;  %2357 = vmatmul.mubr.msk.f32.vlgmr.msra.gmra.mxu0 %vm411_vm2, %v740_v42 }
 0x357   : > { %2360 = vmatpush3.xpose.msk.msra.mxu1 %vm411_vm2, %v820_v35  ;;  %2361 = vmatprep.mubr.msk.f32.mxu1 %vm2630_vm1, %v2629_v6 }
 0x358   : > { %2369 = vmatprep.subr.mxu1 %v2629_v6  ;;  %2366 = vmatprep.mubr.msk.f32.mxu0 %vm2630_vm1, %v2629_v6 }
 0x35a   : > { %2362 = vmatmul.mubr.msk.f32.vlgmr.msra.gmra.mxu1 %vm411_vm2, %v818_v43 }
 0x35b   : > { %2371 = vmatprep.mubr.msk.f32.mxu1 %vm2630_vm1, %v2629_v6 }
 0x412   : > { %v2819_v44 = vpop.f32.mrf.mxu0 }
 0x414   : > { %v2348_v45 = vpop.f32.mrf.mxu0 }
 0x416   : > { %v2821_v46 = vpop.f32.mrf.mxu1  ;;  %v813_v47 = vpop.f32.mrf.mxu0 }
 0x417   : > { %v895_v48 = vmul.f32 0.35355338, %v813_v47 }
 0x418   : > { %v2353_v49 = vpop.f32.mrf.mxu1  ;;  %v2358_v50 = vpop.f32.mrf.mxu0 }
 0x419   : > { %v897_v51 = vsel %vm411_vm2, %v895_v48, -inf }
 0x41a   : > { %v891_v52 = vpop.f32.mrf.mxu1  ;;  %898 = vmax.xlane.f32.xlu1 %v897_v51 }
 0x41b   : > { %v896_v53 = vmul.f32 0.35355338, %v891_v52 }
 0x41c   : > { %v2363_v54 = vpop.f32.mrf.mxu1 }
 0x41d   : > { %v900_v55 = vsel %vm411_vm2, %v896_v53, -inf }
 0x41e   : > { %901 = vmax.xlane.f32.xlu0 %v900_v55 }
 0x42b   : > { %919 = vrot.lane.b32.xlu1 %v2773_v10, %s2635_s23 }
 0x42f   : > { %1073 = vrot.lane.b32.xlu1 %v2773_v10, %s2636_s24 }
 0x433   : > { %1151 = vrot.lane.b32.xlu1 %v2776_v11, %s2636_s24  ;;  %s2254_s24 = sshll.u32 %s2713_s9, 8 }
 0x434   : > { %995 = vrot.lane.b32.xlu0 %v2776_v11, %s2635_s23 }
 0x438   : > { %1071 = vrot.lane.b32.xlu0 %v2773_v10, %s2637_s25 }
 0x4a3   : > { %v899_v56 = vpop.xlane.xlu1 %898 }
 0x4a4   : > { %v903_v57 = vsub.f32 %v895_v48, %v899_v56 }
 0x4a6   : > { %v905_v58 = vmul.f32 1.442695, %v903_v57 }
 0x4a7   : > { %v920_v59 = vpop.permute.xlu1 %919  ;;  %v902_v60 = vpop.xlane.xlu0 %901 }
 0x4a8   : > { %2535 = vpow2.f32 %v905_v58  ;;  %v904_v61 = vsub.f32 %v896_v53, %v902_v60  ;;  %2365 = vmatpush3.msra.mxu0 %v920_v59 }
 0x4a9   : > { %2374 = vmatprep.subr.mxu0 %v2629_v6 }
 0x4aa   : > { %v907_v62 = vmul.f32 1.442695, %v904_v61 }
 0x4ab   : > { %v996_v63 = vpop.permute.xlu0 %995  ;;  %v1074_v7 = vpop.permute.xlu1 %1073 }
 0x4ac   : > { %2537 = vpow2.f32 %v907_v62  ;;  %2370 = vmatpush3.msra.mxu1 %v996_v63 }
 0x4ad   : > { %2379 = vmatprep.subr.mxu1 %v2629_v6 }
 0x4af   : > { %v1152_v8 = vpop.permute.xlu1 %1151  ;;  %v1072_v17 = vpop.permute.xlu0 %1071 }
 0x4b5   : > { %v2536_v0 = vpop.eup %2535 }
 0x4b6   : > { %v909_v1 = vsel %vm411_vm2, %v2536_v0, 0.0 }
 0x4b7   : > { %910 = vadd.xlane.f32.xlu1 %v909_v1 }
 0x4b9   : > { %v2538_v2 = vpop.eup %2537 }
 0x4ba   : > { %v912_v3 = vsel %vm411_vm2, %v2538_v2, 0.0 }
 0x4bb   : > { %913 = vadd.xlane.f32.xlu1 %v912_v3 }
 0x4cc   : > { %1149 = vrot.lane.b32.xlu1 %v2776_v11, %s2637_s25 }
 0x540   : > { %v911_v9 = vpop.xlane.xlu1 %910 }
 0x541   : > { %2539 = vrcp.f32 %v911_v9 }
 0x544   : > { %v914_v12 = vpop.xlane.xlu1 %913 }
 0x545   : > { %2541 = vrcp.f32 %v914_v12 }
 0x548   : > { %v1150_v18 = vpop.permute.xlu1 %1149 }
 0x54e   : > { %v2540_v13 = vpop.eup %2539 }
 0x54f   : > { %v917_v14 = vmul.f32 %v2540_v13, %v2536_v0 }
 0x551   : > { %2367 = vmatmul.mubr.msk.f32.vlgmr.msra.gmra.mxu0 %vm411_vm2, %v917_v14 }
 0x552   : > { %v2542_v15 = vpop.eup %2541  ;;  %2375 = vmatpush3.xpose.msk.msra.mxu0 %vm411_vm2, %v1074_v7  ;;  %2376 = vmatprep.mubr.msk.f32.mxu0 %vm2630_vm1, %v2629_v6 }
 0x553   : > { %v918_v16 = vmul.f32 %v2542_v15, %v2538_v2  ;;  %2384 = vmatprep.subr.mxu0 %v2629_v6 }
 0x555   : > { %2372 = vmatmul.mubr.msk.f32.vlgmr.msra.gmra.mxu1 %vm411_vm2, %v918_v16  ;;  %2377 = vmatmul.mubr.msk.f32.vlgmr.msra.gmra.mxu0 %vm411_vm2, %v1072_v17 }
 0x556   : > { %2380 = vmatpush3.xpose.msk.msra.mxu1 %vm411_vm2, %v1152_v8  ;;  %2381 = vmatprep.mubr.msk.f32.mxu1 %vm2630_vm1, %v2629_v6 }
 0x557   : > { %2389 = vmatprep.subr.mxu1 %v2629_v6  ;;  %2386 = vmatprep.mubr.msk.f32.mxu0 %vm2630_vm1, %v2629_v6 }
 0x559   : > { %2382 = vmatmul.mubr.msk.f32.vlgmr.msra.gmra.mxu1 %vm411_vm2, %v1150_v18 }
 0x55a   : > { %2391 = vmatprep.mubr.msk.f32.mxu1 %vm2630_vm1, %v2629_v6 }
 0x611   : > { %v2851_v19 = vpop.f32.mrf.mxu0 }
 0x613   : > { %v2368_v20 = vpop.f32.mrf.mxu0 }
 0x615   : > { %v2853_v21 = vpop.f32.mrf.mxu1  ;;  %v1145_v22 = vpop.f32.mrf.mxu0 }
 0x616   : > { %v1227_v23 = vmul.f32 0.35355338, %v1145_v22 }
 0x617   : > { %v2373_v24 = vpop.f32.mrf.mxu1  ;;  %v2378_v25 = vpop.f32.mrf.mxu0 }
 0x618   : > { %v1229_v26 = vsel %vm411_vm2, %v1227_v23, -inf  ;;  %v1770_v24 = vld [vmem:[%s3071_s3 + $0x18] sm:$0xff]  ;;  %v1768_v25 = vld [vmem:[%s3071_s3 + $0x8] sm:$0xff] }
 0x619   : > { %v1223_v27 = vpop.f32.mrf.mxu1  ;;  %1230 = vmax.xlane.f32.xlu0 %v1229_v26  ;;  %v1767_v26 = vld [vmem:[%s3071_s3] sm:$0xff] }
 0x61a   : > { %v1228_v28 = vmul.f32 0.35355338, %v1223_v27 }
 0x61b   : > { %v2383_v29 = vpop.f32.mrf.mxu1 }
 0x61c   : > { %v1232_v30 = vsel %vm411_vm2, %v1228_v28, -inf }
 0x61d   : > { %1233 = vmax.xlane.f32.xlu1 %v1232_v30 }
 0x62e   : > { %1251 = vrot.lane.b32.xlu1 %v2773_v10, %s2638_s26 }
 0x62f   : > { %1327 = vrot.lane.b32.xlu0 %v2776_v11, %s2638_s26 }
 0x632   : > { %1405 = vrot.lane.b32.xlu1 %v2773_v10, %s2639_s10 }
 0x636   : > { %1483 = vrot.lane.b32.xlu1 %v2776_v11, %s2639_s10  ;;  %s2644_s10 = smov 24  }
 0x63a   : > { %1481 = vrot.lane.b32.xlu1 %v2776_v11, %s2640_s12 }
 0x6a2   : > { %v1231_v31 = vpop.xlane.xlu0 %1230 }
 0x6a3   : > { %v1235_v32 = vsub.f32 %v1227_v23, %v1231_v31 }
 0x6a5   : > { %v1237_v33 = vmul.f32 1.442695, %v1235_v32 }
 0x6a6   : > { %v1234_v34 = vpop.xlane.xlu1 %1233  ;;  %v1328_v35 = vpop.permute.xlu0 %1327 }
 0x6a7   : > { %2543 = vpow2.f32 %v1237_v33  ;;  %v1236_v36 = vsub.f32 %v1228_v28, %v1234_v34  ;;  %2390 = vmatpush3.msra.mxu1 %v1328_v35 }
 0x6a8   : > { %2399 = vmatprep.subr.mxu1 %v2629_v6 }
 0x6a9   : > { %v1239_v37 = vmul.f32 1.442695, %v1236_v36 }
 0x6aa   : > { %v1252_v38 = vpop.permute.xlu1 %1251 }
 0x6ab   : > { %2545 = vpow2.f32 %v1239_v37  ;;  %2385 = vmatpush3.msra.mxu0 %v1252_v38 }
 0x6ac   : > { %2394 = vmatprep.subr.mxu0 %v2629_v6 }
 0x6ae   : > { %v1406_v47 = vpop.permute.xlu1 %1405 }
 0x6b2   : > { %v1484_v51 = vpop.permute.xlu1 %1483 }
 0x6b4   : > { %v2544_v39 = vpop.eup %2543 }
 0x6b5   : > { %v1241_v40 = vsel %vm411_vm2, %v2544_v39, 0.0 }
 0x6b6   : > { %1242 = vadd.xlane.f32.xlu0 %v1241_v40  ;;  %v1482_v54 = vpop.permute.xlu1 %1481 }
 0x6b8   : > { %v2546_v41 = vpop.eup %2545 }
 0x6b9   : > { %v1244_v42 = vsel %vm411_vm2, %v2546_v41, 0.0 }
 0x6ba   : > { %1245 = vadd.xlane.f32.xlu0 %v1244_v42 }
 0x6d0   : > { %1403 = vrot.lane.b32.xlu0 %v2773_v10, %s2640_s12 }
 0x73f   : > { %v1243_v43 = vpop.xlane.xlu0 %1242 }
 0x740   : > { %2547 = vrcp.f32 %v1243_v43  ;;  %v2238_v43 = vld [vmem:[%s3075_s7] ss:$0 sm:$0xff] }
 0x743   : > { %v1246_v45 = vpop.xlane.xlu0 %1245 }
 0x744   : > { %2549 = vrcp.f32 %v1246_v45 }
 0x747   : > { %v1404_v53 = vpop.permute.xlu0 %1403 }
 0x74d   : > { %v2548_v48 = vpop.eup %2547 }
 0x74e   : > { %v1249_v49 = vmul.f32 %v2548_v48, %v2544_v39 }
 0x750   : > { %2387 = vmatmul.mubr.msk.f32.vlgmr.msra.gmra.mxu0 %vm411_vm2, %v1249_v49 }
 0x751   : > { %v2550_v50 = vpop.eup %2549  ;;  %2395 = vmatpush3.xpose.msk.msra.mxu0 %vm411_vm2, %v1406_v47  ;;  %2396 = vmatprep.mubr.msk.f32.mxu0 %vm2630_vm1, %v2629_v6 }
 0x752   : > { %v1250_v52 = vmul.f32 %v2550_v50, %v2546_v41  ;;  %2404 = vmatprep.subr.mxu0 %v2629_v6 }
 0x754   : > { %2392 = vmatmul.mubr.msk.f32.vlgmr.msra.gmra.mxu1 %vm411_vm2, %v1250_v52  ;;  %2397 = vmatmul.mubr.msk.f32.vlgmr.msra.gmra.mxu0 %vm411_vm2, %v1404_v53 }
 0x755   : > { %2400 = vmatpush3.xpose.msk.msra.mxu1 %vm411_vm2, %v1484_v51  ;;  %2401 = vmatprep.mubr.msk.f32.mxu1 %vm2630_vm1, %v2629_v6 }
 0x756   : > { %2409 = vmatprep.subr.mxu1 %v2629_v6  ;;  %2406 = vmatprep.mubr.msk.f32.mxu0 %vm2630_vm1, %v2629_v6 }
 0x758   : > { %2402 = vmatmul.mubr.msk.f32.vlgmr.msra.gmra.mxu1 %vm411_vm2, %v1482_v54 }
 0x759   : > { %2411 = vmatprep.mubr.msk.f32.mxu1 %vm2630_vm1, %v2629_v6 }
 0x810   : > { %v1323_v55 = vpop.f32.mrf.mxu0 }
 0x812   : > { %v2388_v56 = vpop.f32.mrf.mxu0 }
 0x814   : > { %v1399_v57 = vpop.f32.mrf.mxu1  ;;  %v1477_v58 = vpop.f32.mrf.mxu0 }
 0x815   : > { %v1559_v59 = vmul.f32 0.35355338, %v1477_v58 }
 0x816   : > { %v2393_v60 = vpop.f32.mrf.mxu1  ;;  %v2398_v61 = vpop.f32.mrf.mxu0 }
 0x817   : > { %v1561_v62 = vsel %vm411_vm2, %v1559_v59, -inf  ;;  %v1900_v60 = vld [vmem:[%s3072_s4 + $0x18] sm:$0xff]  ;;  %v1899_v61 = vld [vmem:[%s3072_s4 + $0x10] sm:$0xff] }
 0x818   : > { %v1555_v63 = vpop.f32.mrf.mxu1  ;;  %1562 = vmax.xlane.f32.xlu0 %v1561_v62  ;;  %v1898_v62 = vld [vmem:[%s3072_s4 + $0x8] sm:$0xff] }
 0x819   : > { %v1560_v0 = vmul.f32 0.35355338, %v1555_v63  ;;  %v1897_v63 = vld [vmem:[%s3072_s4] sm:$0xff] }
 0x81a   : > { %v2403_v1 = vpop.f32.mrf.mxu1 }
 0x81b   : > { %v1564_v2 = vsel %vm411_vm2, %v1560_v0, -inf  ;;  %v2005_v1 = vld [vmem:[%s3074_s6 + $0x70] sm:$0xff] }
 0x81c   : > { %1565 = vmax.xlane.f32.xlu1 %v1564_v2  ;;  %v2004_v2 = vld [vmem:[%s3074_s6 + $0x68] sm:$0xff] }
 0x82d   : > { %1583 = vrot.lane.b32.xlu1 %v2773_v10, %s2641_s13 }
 0x831   : > { %1737 = vrot.lane.b32.xlu1 %v2851_v19, %s2642_s17 }
 0x835   : > { %1739 = vrot.lane.b32.xlu1 %v2853_v21, %s2642_s17 }
 0x839   : > { %1747 = vrot.lane.b32.xlu1 %v1399_v57, %s2643_s18 }
 0x8a1   : > { %v1563_v6 = vpop.xlane.xlu0 %1562 }
 0x8a2   : > { %v1567_v3 = vsub.f32 %v1559_v59, %v1563_v6  ;;  %v2003_v6 = vld [vmem:[%s3074_s6 + $0x60] sm:$0xff] }
 0x8a4   : > { %v1569_v7 = vmul.f32 1.442695, %v1567_v3  ;;  %v2002_v3 = vld [vmem:[%s3074_s6 + $0x58] sm:$0xff] }
 0x8a5   : > { %v1566_v8 = vpop.xlane.xlu1 %1565 }
 0x8a6   : > { %2551 = vpow2.f32 %v1569_v7  ;;  %v1568_v9 = vsub.f32 %v1560_v0, %v1566_v8  ;;  %v2006_v0 = vld [vmem:[%s3074_s6 + $0x78] sm:$0xff]  ;;  %v2001_v7 = vld [vmem:[%s3074_s6 + $0x50] sm:$0xff]  ;;  %v2000_v8 = vld [vmem:[%s3074_s6 + $0x48] sm:$0xff] }
 0x8a8   : > { %v1571_v12 = vmul.f32 1.442695, %v1568_v9  ;;  %v1999_v9 = vld [vmem:[%s3074_s6 + $0x40] sm:$0xff] }
 0x8a9   : > { %v1584_v13 = vpop.permute.xlu1 %1583 }
 0x8aa   : > { %2553 = vpow2.f32 %v1571_v12  ;;  %2405 = vmatpush3.msra.mxu0 %v1584_v13  ;;  %v1998_v12 = vld [vmem:[%s3074_s6 + $0x38] sm:$0xff]  ;;  %v1997_v13 = vld [vmem:[%s3074_s6 + $0x30] sm:$0xff] }
 0x8ab   : > { %2436 = vmatprep.subr.mxu0 %v2006_v0 }
 0x8ad   : > { %v1738_v31 = vpop.permute.xlu1 %1737 }
 0x8ae   : > { %v1759_v34 = vsel %vm411_vm2, %v2819_v44, %v1738_v31  ;;  %v1993_v31 = vld [vmem:[%s3074_s6 + $0x10] sm:$0xff] }
 0x8b1   : > { %v1740_v32 = vpop.permute.xlu1 %1739 }
 0x8b2   : > { %v1760_v39 = vsel %vm411_vm2, %v2821_v46, %v1740_v32  ;;  %v1992_v32 = vld [vmem:[%s3074_s6 + $0x8] sm:$0xff] }
 0x8b3   : > { %v2552_v10 = vpop.eup %2551 }
 0x8b4   : > { %v1573_v14 = vsel %vm411_vm2, %v2552_v10, 0.0 }
 0x8b5   : > { %1574 = vadd.xlane.f32.xlu0 %v1573_v14  ;;  %v1748_v35 = vpop.permute.xlu1 %1747  ;;  %v1995_v14 = vld [vmem:[%s3074_s6 + $0x20] sm:$0xff] }
 0x8b6   : > { %v1763_v40 = vsel %vm1761_vm4, %v1760_v39, %v1748_v35 }
 0x8b7   : > { %v2554_v15 = vpop.eup %2553 }
 0x8b8   : > { %v1576_v16 = vsel %vm411_vm2, %v2554_v15, 0.0 }
 0x8b9   : > { %1577 = vadd.xlane.f32.xlu0 %v1576_v16 }
 0x8cf   : > { %1659 = vrot.lane.b32.xlu0 %v2776_v11, %s2641_s13  ;;  %v1769_v11 = vld [vmem:[%s3071_s3 + $0x10] sm:$0xff]  ;;  %s3021_s13 = scalar_lea.hbm %s3076_s8, %s2254_s24 }
 0x8d3   : > { %1745 = vrot.lane.b32.xlu0 %v1323_v55, %s2643_s18  ;;  %s297_s18 = sand.u32 1, %s2619_s28  }
 0x8d4   : > { %s2208_s19 = sshll.u32 %s297_s18, 4  ;;  %s3027_s9 = scalar_lea.sflag [#allocation3], %s297_s18 }
 0x8d5   : > { %s299_s25 = scalar_lea.vmem [#allocation2], %s2208_s19 }
 0x8d6   : > { %s2142_s26 = sshll.u32 %s299_s25, 4  ;;  %s3024_s26 = int_to_ptr.vmem [resolvable:$true] %s2142_s26 }
 0x8d7   : > { %s2567_s19 = scalar_lea.vmem %s3024_s26, 256  ;;  %p2574_p0 = scmp.lt.s32.totalorder %s3024_s26, %s2572_s21 }
 0x8d8   : > { %p2568_p11 = scmp.ne.s32.totalorder %s3024_s26, %s2567_s19  ;;  %p2575_p1 = scmp.lt.s32.totalorder %s2573_s22, %s2567_s19 }
 0x8da   : > { %p2569_p12 = pnand %p2568_p11, %p2730_p5  ;;  %p2576_p2 = por %p2575_p1, %p2574_p0 }
 0x8dc   : > { %p2570_p13 = pneg %p2569_p12 }
 0x8de   : > { %p2577_p3 = pnand %p2576_p2, %p2570_p13 }
 0x93e   : > { %v1575_v17 = vpop.xlane.xlu0 %1574 }
 0x93f   : > { %2555 = vrcp.f32 %v1575_v17 }
 0x942   : > { %v1578_v18 = vpop.xlane.xlu0 %1577 }
 0x943   : > { %2557 = vrcp.f32 %v1578_v18 }
 0x946   : > { %v1660_v19 = vpop.permute.xlu0 %1659 }
 0x947   : > { %2410 = vmatpush3.msra.mxu1 %v1660_v19 }
 0x948   : > { %2414 = vmatprep.subr.mxu1 %v1770_v24 }
 0x94a   : > { %v1746_v33 = vpop.permute.xlu0 %1745 }
 0x94b   : > { %v1762_v36 = vsel %vm1761_vm4, %v1759_v34, %v1746_v33  ;;  %v1991_v33 = vld [vmem:[%s3074_s6] sm:$0xff] }
 0x94c   : > { %v2556_v20 = vpop.eup %2555  ;;  %v2243_v34 = vld [vmem:[%s3073_s5] ss:$0 sm:$0xff] }
 0x94d   : > { %v1581_v21 = vmul.f32 %v2556_v20, %v2552_v10  ;;  %v1996_v10 = vld [vmem:[%s3074_s6 + $0x28] sm:$0xff] }
 0x94f   : > { %2407 = vmatmul.mubr.msk.f32.vlgmr.msra.gmra.mxu0 %vm411_vm2, %v1581_v21 }
 0x950   : > { %v2558_v22 = vpop.eup %2557  ;;  %2437 = vmatpush3.msra.mxu0 %v2006_v0 }
 0x951   : > { %v1582_v23 = vmul.f32 %v2558_v22, %v2554_v15  ;;  %2438 = vmatprep.subr.mxu0 %v2005_v1  ;;  %v2241_v22 = vld [vmem:[%s3075_s7 + $0x2] ss:$0 sm:$0xff] }
 0x952   : > { %2439 = vmatpush3.msra.mxu0 %v2005_v1  ;;  %v2247_v1 = vld [vmem:[%s3075_s7 + $0x4] ss:$0 sm:$0xff] }
 0x953   : > { %2412 = vmatmul.mubr.msk.f32.vlgmr.msra.gmra.mxu1 %vm411_vm2, %v1582_v23  ;;  %2440 = vmatprep.subr.mxu0 %v2004_v2 }
 0x954   : > { %2415 = vmatpush3.msra.mxu1 %v1770_v24  ;;  %2441 = vmatpush3.msra.mxu0 %v2004_v2  ;;  %v2242_v24 = vld [vmem:[%s3075_s7 + $0x3] ss:$0 sm:$0xff] }
 0x955   : > { %2416 = vmatprep.subr.mxu1 %v1769_v11  ;;  %2442 = vmatprep.subr.mxu0 %v2003_v6 }
 0x956   : > { %2417 = vmatpush3.msra.mxu1 %v1769_v11  ;;  %2443 = vmatpush3.msra.mxu0 %v2003_v6 }
 0x957   : > { %2418 = vmatprep.subr.mxu1 %v1768_v25  ;;  %2444 = vmatprep.subr.mxu0 %v2002_v3 }
 0x958   : > { %2419 = vmatpush3.msra.mxu1 %v1768_v25  ;;  %2445 = vmatpush3.msra.mxu0 %v2002_v3  ;;  %v2248_v3 = vld [vmem:[%s3075_s7 + $0x5] ss:$0 sm:$0xff] }
 0x959   : > { %2420 = vmatprep.subr.mxu1 %v1767_v26  ;;  %2446 = vmatprep.subr.mxu0 %v2001_v7 }
 0x95a   : > { %2421 = vmatpush3.msra.mxu1 %v1767_v26  ;;  %2447 = vmatpush3.msra.mxu0 %v2001_v7 }
 0x95b   : > { %2425 = vmatprep.subr.mxu1 %v1900_v60  ;;  %2448 = vmatprep.subr.mxu0 %v2000_v8 }
 0x95c   : > { %2449 = vmatpush3.msra.mxu0 %v2000_v8 }
 0x95d   : > { %2450 = vmatprep.subr.mxu0 %v1999_v9 }
 0x95e   : > { %2451 = vmatpush3.msra.mxu0 %v1999_v9 }
 0x95f   : > { %2452 = vmatprep.subr.mxu0 %v1998_v12 }
 0x960   : > { %2453 = vmatpush3.msra.mxu0 %v1998_v12 }
 0x961   : > { %2454 = vmatprep.subr.mxu0 %v1997_v13 }
 0x962   : > { %2455 = vmatpush3.msra.mxu0 %v1997_v13 }
 0x963   : > { %2456 = vmatprep.subr.mxu0 %v1996_v10 }
 0x964   : > { %2457 = vmatpush3.msra.mxu0 %v1996_v10 }
 0x965   : > { %2458 = vmatprep.subr.mxu0 %v1995_v14 }
 0x966   : > { %2459 = vmatpush3.msra.mxu0 %v1995_v14 }
 0xa0f   : > { %v1655_v27 = vpop.f32.mrf.mxu0 }
 0xa10   : > { %1753 = vrot.lane.b32.xlu0 %v1655_v27, %s2644_s10 }
 0xa11   : > { %v2408_v28 = vpop.f32.mrf.mxu0 }
 0xa13   : > { %v1731_v29 = vpop.f32.mrf.mxu1 }
 0xa14   : > { %1755 = vrot.lane.b32.xlu1 %v1731_v29, %s2644_s10 }
 0xa15   : > { %v2413_v30 = vpop.f32.mrf.mxu1 }
 0xa16   : > { %v1994_v30 = vld [vmem:[%s3074_s6 + $0x18] sm:$0xff] }
 0xa17   : > { %2460 = vmatprep.subr.mxu0 %v1994_v30 }
 0xa18   : > { %2461 = vmatpush3.msra.mxu0 %v1994_v30 }
 0xa19   : > { %2462 = vmatprep.subr.mxu0 %v1993_v31 }
 0xa1a   : > { %2463 = vmatpush3.msra.mxu0 %v1993_v31 }
 0xa1b   : > { %2464 = vmatprep.subr.mxu0 %v1992_v32 }
 0xa1c   : > { %2465 = vmatpush3.msra.mxu0 %v1992_v32 }
 0xa1d   : > { %2466 = vmatprep.subr.mxu0 %v1991_v33 }
 0xa1e   : > { %2467 = vmatpush3.msra.mxu0 %v1991_v33 }
 0xa82   : > { %v1754_v37 = vpop.permute.xlu0 %1753 }
 0xa83   : > { %v1765_v38 = vsel %vm1764_vm3, %v1762_v36, %v1754_v37 }
 0xa84   : > { %2422 = vmatprep.mubr.msk.f32.mxu1 %vm326_vm0, %v1765_v38 }
 0xa86   : > { %v1756_v41 = vpop.permute.xlu1 %1755 }
 0xa87   : > { %v1766_v42 = vsel %vm1764_vm3, %v1763_v40, %v1756_v41  ;;  %v2246_v41 = vld [vmem:[%s3075_s7 + $0x1] ss:$0 sm:$0xff] }
 0xa88   : > { %2423 = vmatmul.mubr.msk.f32.vlgmr.msra.gmra.mxu1 %vm326_vm0, %v1766_v42 }
 0xa89   : > { %2426 = vmatpush3.msra.mxu1 %v1900_v60 }
 0xa8a   : > { %2427 = vmatprep.subr.mxu1 %v1899_v61 }
 0xa8b   : > { %2428 = vmatpush3.msra.mxu1 %v1899_v61 }
 0xa8c   : > { %2429 = vmatprep.subr.mxu1 %v1898_v62 }
 0xa8d   : > { %2430 = vmatpush3.msra.mxu1 %v1898_v62 }
 0xa8e   : > { %2431 = vmatprep.subr.mxu1 %v1897_v63 }
 0xa8f   : > { %2432 = vmatpush3.msra.mxu1 %v1897_v63 }
 0xb48   : > { %v2424_v44 = vpop.f32.mrf.mxu1 }
 0xb49   : > { %v1853_v45 = vadd.f32 %v2424_v44, %v2238_v43 }
 0xb4a   : > { %v1847_v47 = vpop.f32.mrf.mxu1 }
 0xb4b   : > { %v1848_v48 = vadd.f32 %v2238_v43, %v1847_v47  ;;  %v1857_v49 = vadd.f32 %v1853_v45, %v2758_v5 }
 0xb4d   : > { %v1861_v50 = vsel %vm326_vm0, %v1857_v49, 0.0  ;;  %v1856_v51 = vadd.f32 %v1848_v48, %v2756_v4 }
 0xb4e   : > { %1862 = vadd.xlane.f32.xlu1 %v1861_v50 }
 0xb4f   : > { %v1858_v46 = vsel %vm326_vm0, %v1856_v51, 0.0 }
 0xb50   : > { %1859 = vadd.xlane.f32.xlu0 %v1858_v46 }
 0xbd7   : > { %v1863_v52 = vpop.xlane.xlu1 %1862 }
 0xbd8   : > { %v1866_v53 = vmul.f32 0.03125, %v1863_v52 }
 0xbd9   : > { %v1860_v54 = vpop.xlane.xlu0 %1859 }
 0xbda   : > { %v1865_v55 = vmul.f32 0.03125, %v1860_v54  ;;  %v2920_v56 = vsub.f32 %v1857_v49, %v1866_v53 }
 0xbdc   : > { %v2922_v57 = vsub.f32 %v1856_v51, %v1865_v55  ;;  %v1870_v4 = vmul.f32 %v2920_v56, %v2920_v56 }
 0xbde   : > { %v1869_v58 = vmul.f32 %v2922_v57, %v2922_v57  ;;  %v1874_v59 = vsel %vm326_vm0, %v1870_v4, 0.0 }
 0xbe0   : > { %v1871_v5 = vsel %vm326_vm0, %v1869_v58, 0.0 }
 0xbe1   : > { %1872 = vadd.xlane.f32.xlu0 %v1871_v5 }
 0xbe5   : > { %1875 = vadd.xlane.f32.xlu0 %v1874_v59 }
 0xc6a   : > { %v1873_v15 = vpop.xlane.xlu0 %1872 }
 0xc6b   : > { %v1877_v16 = vmul.f32 0.03125, %v1873_v15 }
 0xc6d   : > { %v1879_v17 = vadd.f32 1e-05, %v1877_v16 }
 0xc6e   : > { %v1876_v18 = vpop.xlane.xlu0 %1875 }
 0xc6f   : > { %2559 = vrsqrt.f32 %v1879_v17  ;;  %v1878_v19 = vmul.f32 0.03125, %v1876_v18 }
 0xc71   : > { %v1880_v20 = vadd.f32 1e-05, %v1878_v19 }
 0xc73   : > { %2561 = vrsqrt.f32 %v1880_v20 }
 0xc7c   : > { %v2560_v21 = vpop.eup %2559 }
 0xc7d   : > { %v1883_v23 = vmul.f32 %v2560_v21, %v2922_v57 }
 0xc7f   : > { %v1889_v11 = vmul.f32 %v2241_v22, %v1883_v23 }
 0xc80   : > { %v2562_v25 = vpop.eup %2561 }
 0xc81   : > { %v1884_v26 = vmul.f32 %v2562_v25, %v2920_v56  ;;  %v1895_v27 = vadd.f32 %v2242_v24, %v1889_v11 }
 0xc83   : > { %v1890_v28 = vmul.f32 %v2241_v22, %v1884_v26  ;;  %2433 = vmatprep.mubr.msk.f32.mxu1 %vm326_vm0, %v1895_v27 }
 0xc85   : > { %v1896_v29 = vadd.f32 %v2242_v24, %v1890_v28 }
 0xc87   : > { %2434 = vmatmul.mubr.msk.f32.vlgmr.msra.gmra.mxu1 %vm326_vm0, %v1896_v29 }
 0xd47   : > { %v2435_v35 = vpop.f32.mrf.mxu1 }
 0xd48   : > { %v1986_v36 = vadd.f32 %v2435_v35, %v2243_v34 }
 0xd49   : > { %v1980_v37 = vpop.f32.mrf.mxu1 }
 0xd4a   : > { %v1981_v38 = vadd.f32 %v2243_v34, %v1980_v37  ;;  %v1990_v40 = vmax.f32 %v1986_v36, 0.0 }
 0xd4c   : > { %v1989_v39 = vmax.f32 %v1981_v38, 0.0 }
 0xd4e   : > { %2468 = vmatprep.mubr.f32.mxu0 %v1989_v39 }
 0xd4f   : > { %2469 = vmatmul.mubr.f32.vlgmr.msra.gmra.mxu0 %v1990_v40 }
 0xe0f   : > { %v2470_v42 = vpop.f32.mrf.mxu0 }
 0xe10   : > { %v2083_v43 = vadd.f32 %v2470_v42, %v2246_v41 }
 0xe11   : > { %v2077_v44 = vpop.f32.mrf.mxu0 }
 0xe12   : > { %v2078_v45 = vadd.f32 %v2246_v41, %v2077_v44  ;;  %v2087_v47 = vadd.f32 %v2083_v43, %v1896_v29 }
 0xe14   : > { %v2091_v48 = vsel %vm326_vm0, %v2087_v47, 0.0  ;;  %v2086_v49 = vadd.f32 %v2078_v45, %v1895_v27 }
 0xe15   : > { %2092 = vadd.xlane.f32.xlu0 %v2091_v48 }
 0xe16   : > { %v2088_v50 = vsel %vm326_vm0, %v2086_v49, 0.0 }
 0xe17   : > { %2089 = vadd.xlane.f32.xlu1 %v2088_v50 }
 0xe9e   : > { %v2093_v51 = vpop.xlane.xlu0 %2092 }
 0xe9f   : > { %v2095_v46 = vmul.f32 0.03125, %v2093_v51 }
 0xea0   : > { %v2090_v52 = vpop.xlane.xlu1 %2089 }
 0xea1   : > { %v2097_v53 = vsub.f32 %v2087_v47, %v2095_v46  ;;  %v2094_v54 = vmul.f32 0.03125, %v2090_v52 }
 0xea3   : > { %v2096_v55 = vsub.f32 %v2086_v49, %v2094_v54  ;;  %v2099_v56 = vmul.f32 %v2097_v53, %v2097_v53 }
 0xea5   : > { %v2103_v57 = vsel %vm326_vm0, %v2099_v56, 0.0  ;;  %v2098_v58 = vmul.f32 %v2096_v55, %v2096_v55 }
 0xea6   : > { %2104 = vadd.xlane.f32.xlu0 %v2103_v57 }
 0xea7   : > { %v2100_v5 = vsel %vm326_vm0, %v2098_v58, 0.0 }
 0xea8   : > { %2101 = vadd.xlane.f32.xlu1 %v2100_v5 }
 0xf2f   : > { %v2105_v4 = vpop.xlane.xlu0 %2104 }
 0xf30   : > { %v2107_v59 = vmul.f32 0.03125, %v2105_v4 }
 0xf31   : > { %v2102_v60 = vpop.xlane.xlu1 %2101 }
 0xf32   : > { %v2109_v61 = vadd.f32 1e-05, %v2107_v59  ;;  %v2106_v62 = vmul.f32 0.03125, %v2102_v60 }
 0xf34   : > { %2563 = vrsqrt.f32 %v2109_v61  ;;  %v2108_v63 = vadd.f32 1e-05, %v2106_v62 }
 0xf36   : > { %2565 = vrsqrt.f32 %v2108_v63 }
 0xf41   : > { %v2564_v0 = vpop.eup %2563 }
 0xf42   : > { %v2113_v2 = vmul.f32 %v2564_v0, %v2097_v53 }
 0xf43   : > { %v2566_v6 = vpop.eup %2565 }
 0xf44   : > { %v2119_v7 = vmul.f32 %v2247_v1, %v2113_v2  ;;  %v2112_v8 = vmul.f32 %v2566_v6, %v2096_v55 }
 0xf46   : > { %v2118_v9 = vmul.f32 %v2247_v1, %v2112_v8  ;;  %v2125_v12 = vadd.f32 %v2248_v3, %v2119_v7 }
 0xf48   : > { %v2124_v13 = vadd.f32 %v2248_v3, %v2118_v9  ;;  %2127 = vst.msk [vmem:[%s299_s25 + $0x8] sm:$0xff] %vm326_vm0, %v2125_v12 }
 0xf4a   : > { %2126 = vst.msk [vmem:[%s299_s25] sm:$0xff] %vm326_vm0, %v2124_v13 }
 0xf4b   : > { %2580 = shalt.err (!%p2577_p3)
}
 0xf4c   : > { %s2581_s18 = scalar_lea.hbm %s3021_s13, 256  ;;  %s2585_s25 = scalar_lea.hbm %s3076_s8, 512 }
 0xf4d   : > { %p2582_p4 = scmp.ne.s32.totalorder %s3021_s13, %s2581_s18  ;;  %p2586_p9 = scmp.lt.s32.totalorder %s3021_s13, %s3076_s8 }
 0xf4e   : > { %p2587_p10 = scmp.lt.s32.totalorder %s2585_s25, %s2581_s18 }
 0xf4f   : > { %p2583_p7 = pnand %p2582_p4, %p2730_p5 }
 0xf50   : > { %p2588_p11 = por %p2587_p10, %p2586_p9 }
 0xf51   : > { %p2584_p8 = pneg %p2583_p7 }
 0xf53   : > { %p2589_p12 = pnand %p2588_p11, %p2584_p8 }
 0xf55   : > { %2592 = shalt.err (!%p2589_p12)
}
 0xf56   : > { %s2646_s19 = smov 128  }
 0xf57   : > { %2471 = dma.vmem_to_hbm [thread:$0]  (%p2730_p5), %s3024_s26, 256, %s3021_s13, %s3027_s9, %s2646_s19, %s2646_s19, %s2642_s17  }
 0xf58 PF: > { %p2477_p13 = scmp.ge.s32.totalorder %s2627_s30, 2  ;;  %s2157_s20 = sand.u32 1, %s2615_s27  }
 0xf59   : > { %s2158_s21 = scalar_lea.sflag [#allocation3], %s2157_s20 }
 0xf5a   : > { %p2474_p0 = pnand %p2477_p13, %p2734_p6 }
 0xf5c   : > { %p2475_p1 = pneg %p2474_p0 }
 0xf5e   : > { %2610 = dma.done.wait (%p2475_p1), %s2158_s21, 256  }
 0xf5f   : > { %2612 = vsyncadd (%p2475_p1), %s2158_s21, 4294967040  ;;  %p18_p2 = scmp.ge.s32.totalorder %s2717_s11, 4   ;;  %s3079_s27 = smov %s2619_s28 }
 0xf60   : > { %s3080_s28 = smov %s2623_s29  ;;  %s3081_s29 = smov %s2728_s14 }
 0xf61   : > { %s3082_s30 = smov %s2717_s11  ;;  %20 = sbr.rel (!%p18_p2) target bundleno = 3 (0x3), region = 87 }
 0xf66   :  { %2163 = vsyncpa [#allocation3], 1 }
 0xf67   :  { %2165 = vsyncpa [#allocation3 + $0x1], 1 }

</bundles_post_ra>
